<compile_context>
chip_gen: v7x
topology: tpu7x:2x2x1
jax: 0.10.0
libtpu: 0.0.40
codegen_flags: <defaults>
</compile_context>

<pallas_src>
import functools

import jax
import jax.numpy as jnp
from jax.experimental import pallas as pl
from jax.experimental.pallas import tpu as pltpu


def _round_up(x, m):
    return ((x + m - 1) // m) * m


def _pick_tile_hw(hw, channels, out_mult, budget_bytes=40 << 20):
    """Largest multiple-of-512 spatial tile whose double-buffered working set
    (x input + output, f32) stays under `budget_bytes`."""
    per_lane_bytes = (2 + 2 * out_mult) * channels * 4
    max_lanes = max(512, (budget_bytes // per_lane_bytes) // 512 * 512)
    tile = int(min(max_lanes, _round_up(hw, 512)))
    hw_pad = _round_up(hw, tile)
    return tile, hw_pad


# ------------------- pass 1: tiled global sum-pool over HW -------------------

def _pool_kernel(x_ref, sum_ref):
    # x_ref: (1, C, TILE_HW); sum_ref: (1, C, 1), resident across the HW axis.
    @pl.when(pl.program_id(1) == 0)
    def _():
        sum_ref[...] = jnp.zeros_like(sum_ref)

    sum_ref[...] += jnp.sum(x_ref[0].astype(jnp.float32), axis=1, keepdims=True)[None]


def _spatial_pool_sum(x_flat, tile_hw):
    N, C, HWp = x_flat.shape
    return pl.pallas_call(
        _pool_kernel,
        out_shape=jax.ShapeDtypeStruct((N, C, 1), jnp.float32),
        grid_spec=pltpu.PrefetchScalarGridSpec(
            num_scalar_prefetch=0,
            grid=(N, HWp // tile_hw),
            in_specs=[pl.BlockSpec((1, C, tile_hw), lambda n, t: (n, 0, t))],
            out_specs=pl.BlockSpec((1, C, 1), lambda n, t: (n, 0, 0)),
        ),
        compiler_params=pltpu.CompilerParams(
            dimension_semantics=("parallel", "arbitrary"),
            vmem_limit_bytes=64 << 20),
    )(x_flat)


# ------------------- pass 2: streaming apply of both gates -------------------

def _apply_kernel(x_ref, gate_ref, ws_ref, o_ref, *, channels, concat):
    xb = x_ref[0]                    # (C, TILE_HW)
    chn_gate = gate_ref[0]           # (C, 1), already sigmoid'ed channel gate

    # spatial SE: 1x1 conv C->1 (no bias) + sigmoid, as a (1,C)@(C,TILE) matmul.
    s = jnp.dot(ws_ref[...], xb, preferred_element_type=jnp.float32)   # (1, TILE_HW)
    spa_gate = jax.nn.sigmoid(s)

    if concat:
        o_ref[0, :channels, :] = (xb * chn_gate).astype(o_ref.dtype)
        o_ref[0, channels:, :] = (xb * spa_gate).astype(o_ref.dtype)
    else:
        # Fused: one broadcast add + one full-tile multiply (saves a VPU pass).
        o_ref[0] = (xb * (chn_gate + spa_gate)).astype(o_ref.dtype)


def scse_forward(x, w1, b1, w2, b2, ws, *, concat=False):
    """x: (N, C, H, W) float32 (NCHW, same as the PyTorch module).

    w1: (C//r, C), b1: (C//r, 1)   -- fc1 1x1 conv
    w2: (C, C//r), b2: (C, 1)      -- fc2 1x1 conv
    ws: (1, C)                     -- spatial_se 1x1 conv (no bias)
    """
    N, C, H, W = x.shape
    HW = H * W
    out_c = 2 * C if concat else C
    out_mult = 2 if concat else 1

    tile_hw, hw_pad = _pick_tile_hw(HW, C, out_mult)

    x_flat = x.reshape(N, C, HW)
    if hw_pad != HW:
        x_flat = jnp.pad(x_flat, ((0, 0), (0, 0), (0, hw_pad - HW)))

    # --- channel squeeze: Pallas tiled pooling + tiny FCs in plain XLA ------
    pool_sum = _spatial_pool_sum(x_flat, tile_hw)             # (N, C, 1) sums
    pooled = pool_sum[:, :, 0] * (1.0 / HW)                   # true-HW mean, (N, C)
    h = jnp.maximum(pooled @ w1.T + b1[:, 0], 0.0)            # (N, C//r)
    chn_gate = jax.nn.sigmoid(h @ w2.T + b2[:, 0])            # (N, C)
    chn_gate = chn_gate[:, :, None].astype(jnp.float32)       # (N, C, 1)

    kernel = functools.partial(_apply_kernel, channels=C, concat=concat)

    out = pl.pallas_call(
        kernel,
        out_shape=jax.ShapeDtypeStruct((N, out_c, hw_pad), x.dtype),
        grid_spec=pltpu.PrefetchScalarGridSpec(
            num_scalar_prefetch=0,
            grid=(N, hw_pad // tile_hw),
            in_specs=[
                pl.BlockSpec((1, C, tile_hw), lambda n, t: (n, 0, t)),   # x tile
                pl.BlockSpec((1, C, 1), lambda n, t: (n, 0, 0)),         # channel gate
                pl.BlockSpec((1, C), lambda n, t: (0, 0)),               # spatial_se weight
            ],
            out_specs=pl.BlockSpec((1, out_c, tile_hw), lambda n, t: (n, 0, t)),
        ),
        compiler_params=pltpu.CompilerParams(
            dimension_semantics=("parallel", "parallel"),
            vmem_limit_bytes=64 << 20),
    )(x_flat, chn_gate, ws)

    if hw_pad != HW:
        out = out[:, :, :HW]
    return out.reshape(N, out_c, H, W)


def reference_forward(x, w1, b1, w2, b2, ws, *, concat=False):
    # Pure-JAX reference mirroring the PyTorch forward.
    pooled = jnp.mean(x, axis=(2, 3))                                # (N, C)
    h = jnp.maximum(pooled @ w1.T + b1[:, 0], 0.0)                   # (N, Cr)
    gate = jax.nn.sigmoid(h @ w2.T + b2[:, 0])                       # (N, C)
    chn_se = x * gate[:, :, None, None]
    spa = jax.nn.sigmoid(jnp.einsum("nchw,c->nhw", x, ws[0]))        # (N, H, W)
    spa_se = x * spa[:, None, :, :]
    if concat:
        return jnp.concatenate([chn_se, spa_se], axis=1)
    return chn_se + spa_se


if __name__ == "__main__":
    # Small shapes consistent with the module: channels divisible by reduction=16.
    N, C, H, W = 2, 32, 8, 8
    reduction = 16
    Cr = C // reduction

    key = jax.random.PRNGKey(0)
    kx, k1, kb1, k2, kb2, ks = jax.random.split(key, 6)

    x = jax.random.normal(kx, (N, C, H, W), dtype=jnp.float32)
    # Deterministic synthetic parameters (1x1 convs == dense layers over channels).
    w1 = jax.random.normal(k1, (Cr, C), dtype=jnp.float32) * 0.1   # fc1: C -> C/r
    b1 = jax.random.normal(kb1, (Cr, 1), dtype=jnp.float32) * 0.1
    w2 = jax.random.normal(k2, (C, Cr), dtype=jnp.float32) * 0.1   # fc2: C/r -> C
    b2 = jax.random.normal(kb2, (C, 1), dtype=jnp.float32) * 0.1
    ws = jax.random.normal(ks, (1, C), dtype=jnp.float32) * 0.1    # spatial_se conv, no bias

    out = jax.block_until_ready(scse_forward(x, w1, b1, w2, b2, ws, concat=False))
    ref = reference_forward(x, w1, b1, w2, b2, ws, concat=False)
    assert out.shape == (N, C, H, W)
    assert jnp.allclose(out, ref, atol=1e-5, rtol=1e-5), "mismatch vs reference"

    # Also exercise the concat=True branch.
    out_cat = jax.block_until_ready(scse_forward(x, w1, b1, w2, b2, ws, concat=True))
    ref_cat = reference_forward(x, w1, b1, w2, b2, ws, concat=True)
    assert out_cat.shape == (N, 2 * C, H, W)
    assert jnp.allclose(out_cat, ref_cat, atol=1e-5, rtol=1e-5), "concat mismatch vs reference"

    print("KERNEL_OK")
</pallas_src>

<mosaic_0001>
module attributes {stable_mosaic.version = 11 : i64} {
  func.func @_pool_kernel(%arg0: i32, %arg1: i32, %arg2: memref<1x32x512xf32, #tpu.memory_space<vmem>>, %arg3: memref<1x32x1xf32, #tpu.memory_space<vmem>>) attributes {dimension_semantics = [#tpu.dimension_semantics<parallel>, #tpu.dimension_semantics<arbitrary>], iteration_bounds = array<i64: 2, 1>, scalar_prefetch = 0 : i64, scratch_operands = 0 : i64, tpu.core_type = #tpu.core_type<tc>, window_params = [{transform_indices = @transform_0, window_bounds = array<i64: 1, 32, 512>}, {transform_indices = @transform_1, window_bounds = array<i64: 1, 32, 1>}]} {
    %c0_i32 = arith.constant 0 : i32
    %0 = arith.cmpi eq, %arg1, %c0_i32 : i32
    %1 = arith.extui %0 : i1 to i32
    %c0_i32_0 = arith.constant 0 : i32
    %2 = arith.cmpi ne, %1, %c0_i32_0 : i32
    scf.if %2 {
      %cst_9 = arith.constant 0.000000e+00 : f32
      %11 = vector.broadcast %cst_9 : f32 to vector<1x32x1xf32>
      %c0_10 = arith.constant 0 : index
      %c0_11 = arith.constant 0 : index
      %c0_12 = arith.constant 0 : index
      %12 = vector.load %arg3[%c0_10, %c0_11, %c0_12] : memref<1x32x1xf32, #tpu.memory_space<vmem>>, vector<1x32x1xf32>
      tpu.vector_store %arg3[%c0_10, %c0_11, %c0_12], %11 {strides = array<i32>} : memref<1x32x1xf32, #tpu.memory_space<vmem>>, vector<1x32x1xf32>,
    } else {
    }
    %c0 = arith.constant 0 : index
    %c0_1 = arith.constant 0 : index
    %c0_2 = arith.constant 0 : index
    %3 = vector.load %arg3[%c0, %c0_1, %c0_2] : memref<1x32x1xf32, #tpu.memory_space<vmem>>, vector<1x32x1xf32>
    %c0_3 = arith.constant 0 : index
    %c0_4 = arith.constant 0 : index
    %c0_5 = arith.constant 0 : index
    %4 = vector.load %arg2[%c0_3, %c0_4, %c0_5] : memref<1x32x512xf32, #tpu.memory_space<vmem>>, vector<1x32x512xf32>
    %5 = vector.shape_cast %4 : vector<1x32x512xf32> to vector<32x512xf32>
    %cst = arith.constant dense<0.000000e+00> : vector<32xf32>
    %6 = vector.multi_reduction <add>, %5, %cst [1] : vector<32x512xf32> to vector<32xf32>
    %7 = vector.shape_cast %6 : vector<32xf32> to vector<32x1xf32>
    %8 = vector.shape_cast %7 : vector<32x1xf32> to vector<1x32x1xf32>
    %9 = arith.addf %3, %8 : vector<1x32x1xf32>
    %c0_6 = arith.constant 0 : index
    %c0_7 = arith.constant 0 : index
    %c0_8 = arith.constant 0 : index
    %10 = vector.load %arg3[%c0_6, %c0_7, %c0_8] : memref<1x32x1xf32, #tpu.memory_space<vmem>>, vector<1x32x1xf32>
    tpu.vector_store %arg3[%c0_6, %c0_7, %c0_8], %9 {strides = array<i32>} : memref<1x32x1xf32, #tpu.memory_space<vmem>>, vector<1x32x1xf32>,
    return
  }
  func.func @transform_0(%arg0: i32, %arg1: i32) -> (i32, i32, i32) {
    %c0_i32 = arith.constant 0 : i32
    %c0_i32_0 = arith.constant 0 : i32
    return %arg0, %c0_i32, %arg1 : i32, i32, i32
  }
  func.func @transform_1(%arg0: i32, %arg1: i32) -> (i32, i32, i32) {
    %c0_i32 = arith.constant 0 : i32
    %c0_i32_0 = arith.constant 0 : i32
    %c0_i32_1 = arith.constant 0 : i32
    return %arg0, %c0_i32, %c0_i32_0 : i32, i32, i32
  }
}

</mosaic_0001>

<bundles_post_ra>
// kernel: tpu_custom_call.1
= control target key start
LH: loop header
LB: loop body
LE: loop exit
PB: predicated region body
PF: predicated region fallthrough
CT: control target
= control target key end

     0   :  { %6 = vsyncpa [#allocation3], 0  ;;  %s740_s0 = inlined_call_operand.hbm [shape: f32[2,32,512], index: 0, kind: input, shape index: {}]   ;;  %s741_s1 = inlined_call_operand.hbm [shape: f32[2,32,1], index: 1, kind: output, shape index: {}]  }
   0x1   :  { %8 = vsyncpa [#allocation3 + $0x1], 0 }
   0x2   :  { %9 = vsyncpa [#allocation4], 0 }
   0x3   :  { %11 = vsyncpa [#allocation4 + $0x1], 0  ;;  %s523_s6 = smov 0   ;;  %s525_s7 = smov 0  }
   0x4   :  { %s527_s8 = smov 0   ;;  %s529_s9 = smov 0  }
   0x5   :  { %s531_s10 = smov 0   ;;  %s533_s11 = smov 0  }
   0x6 LB: > { %s308_s12 = sadd.s32 4294967295, %s504_s11   ;;  %s309_s13 = sadd.s32 4294967294, %s504_s11   ;;  %s504_s11 = sphi %s533_s11, %s17_s11   ;;  %s500_s10 = sphi %s531_s10, %s756_s10   ;;  %s496_s9 = sphi %s529_s9, %s755_s9   ;;  %s492_s8 = sphi %s527_s8, %s754_s8   ;;  %s488_s7 = sphi %s525_s7, %s753_s7   ;;  %s484_s6 = sphi %s523_s6, %s752_s6  }
   0x7   : > { %s29_s14 = sadd.s32 1, %s500_s10  ;;  %s38_s15 = sadd.s32 1, %s492_s8 }
   0x8   : > { %p31_p0 = scmp.ge.s32.totalorder %s29_s14, 2  ;;  %p45_p1 = scmp.ne.s32.totalorder %s492_s8, %s488_s7 }
   0x9   : > { %p46_p2 = scmp.eq.s32.totalorder %s504_s11, 0  ;;  %p51_p3 = scmp.ne.s32.totalorder %s488_s7, %s484_s6 }
   0xa   : > { %s758_s14 = smov (%p31_p0, %s29_s14), 0  ;;  %p52_p5 = scmp.eq.s32.totalorder %s308_s12, 0 }
   0xb   : > { %p564_p4 = por %p46_p2, %p45_p1  ;;  %s33_s17 = ssub.s32 %s500_s10, %s758_s14 }
   0xc   : > { %p75_p6 = scmp.eq.s32.totalorder %s308_s12, 1  ;;  %p36_p7 = scmp.eq.s32.totalorder %s33_s17, 0 }
   0xd   : > { %p570_p8 = por %p52_p5, %p51_p3  ;;  %p81_p10 = scmp.eq.s32.totalorder %s309_s13, 1 }
   0xe   : > { %p574_p9 = por %p75_p6, %p45_p1  ;;  %p337_p13 = scmp.lt.s32.totalorder %s504_s11, 2 }
   0xf   : > { %s579_s20 = scalar_select %p36_p7, %s492_s8, %s38_s15  }
  0x10   : > { %s745_s19 = scalar_select %p574_p9, 1, 0 }
  0x11   : > { %p581_p11 = por %p81_p10, %p51_p3  ;;  %s101_s22 = sand.u32 1, %s492_s8  }
  0x12   : > { %s312_s23 = sshll.u32 %s101_s22, 7  ;;  %s323_s24 = sshll.u32 %s500_s10, 11 }
  0x13   : > { %s746_s21 = scalar_select %p581_p11, 1, 0 }
  0x14   : > { %s592_s27 = scalar_lea.hbm %s740_s0, %s323_s24  ;;  %s105_s28 = scalar_lea.vmem [#allocation2], %s312_s23 }
  0x15   : > { %s114_s29 = sshll.u32 %s105_s28, 4  ;;  %p598_p0 = pnand %p337_p13, %p564_p4  ;;  %s594_s29 = int_to_ptr.vmem [resolvable:$true] %s114_s29 }
  0x16   : > { %s603_s2 = scalar_lea.sflag [#allocation3], %s101_s22  ;;  %s392_s3 = scalar_lea.hbm %s592_s27, 2048 }
  0x17   : > { %p393_p2 = scmp.ne.s32.totalorder %s592_s27, %s392_s3  ;;  %p394_p3 = pneg %p598_p0 }
  0x18   : > { %s397_s12 = scalar_lea.hbm %s740_s0, 4096  ;;  %p398_p4 = scmp.lt.u32.totalorder %s592_s27, %s740_s0 }
  0x19   : > { %p395_p5 = pnand %p394_p3, %p393_p2  ;;  %p399_p7 = scmp.lt.u32.totalorder %s397_s12, %s392_s3 }
  0x1a   : > { %p401_p13 = scmp.lt.u32.totalorder %s392_s3, %s592_s27 }
  0x1b   : > { %p396_p6 = pneg %p395_p5  ;;  %p400_p10 = por %p399_p7, %p398_p4 }
  0x1d   : > { %p402_p12 = por %p401_p13, %p400_p10 }
  0x1f   : > { %p403_p1 = pnand %p402_p12, %p396_p6 }
  0x21   : > { %406 = shalt.err (!%p403_p1)
}
  0x22   : > { %s407_s16 = scalar_lea.vmem %s594_s29, 2048  ;;  %s506_s17 = smov [#allocation2]  }
  0x23   : > { %p408_p2 = scmp.ne.s32.totalorder %s594_s29, %s407_s16  ;;  %s412_s22 = sshll.u32 %s506_s17, 4  ;;  %s413_s22 = int_to_ptr.vmem [resolvable:$false] %s412_s22 }
  0x24   : > { %s414_s23 = scalar_lea.vmem %s413_s22, 4096  ;;  %p415_p9 = scmp.lt.s32.totalorder %s594_s29, %s413_s22 }
  0x25   : > { %p410_p5 = pnand %p408_p2, %p394_p3  ;;  %p416_p4 = scmp.lt.s32.totalorder %s414_s23, %s407_s16 }
  0x27   : > { %p411_p11 = pneg %p410_p5  ;;  %p417_p7 = por %p416_p4, %p415_p9 }
  0x29   : > { %p418_p10 = pnand %p417_p7, %p411_p11 }
  0x2b   : > { %421 = shalt.err (!%p418_p10)
}
  0x2c   : > { %s507_s24 = smov 512   ;;  %s508_s25 = smov 32  }
  0x2d   : > { %332 = dma.hbm_to_vmem [thread:$0]  (!%p598_p0), %s592_s27, 2048, %s594_s29, %s603_s2, %s507_s24, %s507_s24, %s508_s25  }
  0x2e   : > { %p122_p12 = scmp.lt.s32.totalorder %s504_s11, 3  ;;  %p748_p1 = scmp.ge.s32.totalorder %s504_s11, 1 }
  0x30   : > { %p123_p3 = pnand %p748_p1, %p122_p12 }
  0x31   : > { %s635_s26 = sand.u32 (!%p123_p3), 1, %s488_s7  }
  0x32   : > { %126 = sbr.rel (%p123_p3) target bundleno = 229 (0xe5), region = 24  ;;  %s316_s28 = sshll.u32 (!%p123_p3), %s635_s26, 7 }
  0x33   : > { %s129_s3 = scalar_lea.sflag (!%p123_p3), [#allocation3], %s635_s26  ;;  %s639_s4 = scalar_lea.vmem (!%p123_p3), [#allocation2], %s316_s28 }
  0x39   : > { %475 = dma.done.wait (%p570_p8), %s129_s3, 2048  }
  0x3a   : > { %477 = vsyncadd (%p570_p8), %s129_s3, 4294965248  ;;  %s317_s27 = sshll.u32 %s635_s26, 5  ;;  %vm156_vm0 = vcmask 7168   ;;  %v509_v0 = vmov 0.0   ;;  %v173_v1 = vld [vmem:[%s639_s4 + $0x40] sm:$0xff]  ;;  %v174_v2 = vld [vmem:[%s639_s4 + $0x48] sm:$0xff] }
  0x3b   : > { %s646_s29 = scalar_lea.vmem [#allocation5], %s317_s27  ;;  %v175_v3 = vld [vmem:[%s639_s4 + $0x50] sm:$0xff]  ;;  %v191_v4 = vadd.f32 %v174_v2, %v173_v1  ;;  %v165_v5 = vld [vmem:[%s639_s4] sm:$0xff]  ;;  %v166_v6 = vld [vmem:[%s639_s4 + $0x8] sm:$0xff]  ;;  %s324_s18 = sshll.u32 %s496_s9, 9 }
  0x3c   : > { %159 = vst.msk [vmem:[%s646_s29 + $0x10] sm:$0xff] %vm156_vm0, %v509_v0  ;;  %157 = vst.msk [vmem:[%s646_s29] sm:$0xff] %vm156_vm0, %v509_v0  ;;  %v176_v7 = vld [vmem:[%s639_s4 + $0x58] sm:$0xff]  ;;  %v167_v8 = vld [vmem:[%s639_s4 + $0x10] sm:$0xff]  ;;  %v181_v9 = vadd.f32 %v166_v6, %v165_v5  ;;  %s224_s30 = sshll.u32 %s646_s29, 4  ;;  %s685_s12 = scalar_lea.hbm %s741_s1, %s324_s18  ;;  %s687_s30 = int_to_ptr.vmem [resolvable:$true] %s224_s30 }
  0x3d   : > { %158 = vst.msk [vmem:[%s646_s29 + $0x8] sm:$0xff] %vm156_vm0, %v509_v0  ;;  %160 = vst.msk [vmem:[%s646_s29 + $0x18] sm:$0xff] %vm156_vm0, %v509_v0  ;;  %v177_v10 = vld [vmem:[%s639_s4 + $0x60] sm:$0xff]  ;;  %v192_v11 = vadd.f32 %v191_v4, %v175_v3  ;;  %v168_v12 = vld [vmem:[%s639_s4 + $0x18] sm:$0xff]  ;;  %s211_s9 = scalar_lea.sflag [#allocation4], %s635_s26  ;;  %s422_s13 = scalar_lea.vmem %s687_s30, 512 }
  0x3e   : > { %v178_v13 = vld [vmem:[%s639_s4 + $0x68] sm:$0xff]  ;;  %v179_v14 = vld [vmem:[%s639_s4 + $0x70] sm:$0xff]  ;;  %v182_v15 = vadd.f32 %v181_v9, %v167_v8  ;;  %v169_v17 = vld [vmem:[%s639_s4 + $0x20] sm:$0xff]  ;;  %p423_p8 = scmp.ne.s32.totalorder %s687_s30, %s422_s13  ;;  %p749_p9 = scmp.ne.s32.totalorder %s745_s19, 0 }
  0x3f   : > { %v196_v16 = vadd.f32 %v178_v13, %v177_v10  ;;  %v170_v18 = vld [vmem:[%s639_s4 + $0x28] sm:$0xff]  ;;  %v171_v19 = vld [vmem:[%s639_s4 + $0x30] sm:$0xff]  ;;  %v193_v20 = vadd.f32 %v192_v11, %v176_v7  ;;  %v180_v21 = vld [vmem:[%s639_s4 + $0x78] sm:$0xff]  ;;  %s510_s15 = smov [#allocation5]  }
  0x40   : > { %v186_v22 = vadd.f32 %v170_v18, %v169_v17  ;;  %v183_v23 = vadd.f32 %v182_v15, %v168_v12  ;;  %v172_v25 = vld [vmem:[%s639_s4 + $0x38] sm:$0xff]  ;;  %p424_p11 = pnand %p423_p8, %p749_p9  ;;  %s426_s16 = sshll.u32 %s510_s15, 4  ;;  %s427_s16 = int_to_ptr.vmem [resolvable:$false] %s426_s16 }
  0x41   : > { %v197_v24 = vadd.f32 %v196_v16, %v179_v14  ;;  %194 = vadd.xlane.f32.xlu1 %v193_v20  ;;  %s428_s17 = scalar_lea.vmem %s427_s16, 1024  ;;  %p429_p6 = scmp.lt.s32.totalorder %s687_s30, %s427_s16 }
  0x42   : > { %v187_v26 = vadd.f32 %v186_v22, %v171_v19  ;;  %184 = vadd.xlane.f32.xlu0 %v183_v23  ;;  %p425_p0 = pneg %p424_p11  ;;  %p430_p13 = scmp.lt.s32.totalorder %s428_s17, %s422_s13 }
  0x43   : > { %v198_v27 = vadd.f32 %v197_v24, %v180_v21  ;;  %v163_v29 = vld [vmem:[%s646_s29 + $0x10] sm:$0xff]  ;;  %v161_v30 = vld [vmem:[%s646_s29] sm:$0xff] }
  0x44   : > { %v188_v28 = vadd.f32 %v187_v26, %v172_v25  ;;  %v164_v35 = vld [vmem:[%s646_s29 + $0x18] sm:$0xff]  ;;  %v162_v36 = vld [vmem:[%s646_s29 + $0x8] sm:$0xff]  ;;  %p431_p2 = por %p430_p13, %p429_p6 }
  0x45   : > { %199 = vadd.xlane.f32.xlu1 %v198_v27 }
  0x46   : > { %189 = vadd.xlane.f32.xlu0 %v188_v28  ;;  %p432_p5 = pnand %p431_p2, %p425_p0 }
  0xce   : > { %v195_v31 = vpop.xlane.xlu1 %194 }
  0xcf   : > { %v203_v32 = vadd.f32 %v195_v31, %v163_v29  ;;  %v185_v33 = vpop.xlane.xlu0 %184 }
  0xd0   : > { %v201_v34 = vadd.f32 %v185_v33, %v161_v30 }
  0xd1   : > { %208 = vst.msk [vmem:[%s646_s29 + $0x10] sm:$0xff] %vm156_vm0, %v203_v32 }
  0xd2   : > { %206 = vst.msk [vmem:[%s646_s29] sm:$0xff] %vm156_vm0, %v201_v34  ;;  %v200_v37 = vpop.xlane.xlu1 %199 }
  0xd3   : > { %v204_v38 = vadd.f32 %v200_v37, %v164_v35  ;;  %v190_v39 = vpop.xlane.xlu0 %189 }
  0xd4   : > { %v202_v40 = vadd.f32 %v190_v39, %v162_v36 }
  0xd5   : > { %209 = vst.msk [vmem:[%s646_s29 + $0x18] sm:$0xff] %vm156_vm0, %v204_v38 }
  0xd6   : > { %207 = vst.msk [vmem:[%s646_s29 + $0x8] sm:$0xff] %vm156_vm0, %v202_v40 }
  0xd7   : > { %435 = shalt.err (!%p432_p5)
}
  0xd8   : > { %s436_s22 = scalar_lea.hbm %s685_s12, 512  ;;  %s440_s25 = scalar_lea.hbm %s741_s1, 1024 }
  0xd9   : > { %p437_p4 = scmp.ne.s32.totalorder %s685_s12, %s436_s22  ;;  %p441_p12 = scmp.lt.u32.totalorder %s685_s12, %s741_s1 }
  0xda   : > { %p442_p1 = scmp.lt.u32.totalorder %s440_s25, %s436_s22  ;;  %p444_p8 = scmp.lt.u32.totalorder %s436_s22, %s685_s12 }
  0xdb   : > { %p438_p7 = pnand %p437_p4, %p749_p9 }
  0xdc   : > { %p443_p3 = por %p442_p1, %p441_p12 }
  0xdd   : > { %p439_p10 = pneg %p438_p7 }
  0xde   : > { %p445_p11 = por %p444_p8, %p443_p3 }
  0xe0   : > { %p446_p0 = pnand %p445_p11, %p439_p10 }
  0xe2   : > { %449 = shalt.err (!%p446_p0)
}
  0xe3   : > { %s511_s4 = smov 128   ;;  %s512_s27 = smov 8  }
  0xe4   : > { %327 = dma.vmem_to_hbm [thread:$0]  (%p749_p9), %s687_s30, 512, %s685_s12, %s211_s9, %s511_s4, %s511_s4, %s512_s27  }
  0xe5 PF: > { %s239_s29 = sand.u32 1, %s484_s6   ;;  %p750_p6 = scmp.ne.s32.totalorder %s746_s21, 0 }
  0xe6   : > { %p751_p13 = scmp.ge.s32.totalorder %s504_s11, 2  ;;  %s240_s18 = scalar_lea.sflag [#allocation4], %s239_s29 }
  0xe8   : > { %p334_p2 = pnand %p751_p13, %p750_p6 }
  0xea   : > { %479 = dma.done.wait (!%p334_p2), %s240_s18, 512  }
  0xeb   : > { %481 = vsyncadd (!%p334_p2), %s240_s18, 4294966784  ;;  %s17_s11 = sadd.s32 1, %s504_s11   ;;  %s752_s6 = smov %s488_s7 }
  0xec   : > { %p14_p5 = scmp.ge.s32.totalorder %s17_s11, 4   ;;  %s753_s7 = smov %s492_s8 }
  0xed   : > { %s754_s8 = smov %s579_s20  ;;  %s755_s9 = smov %s500_s10 }
  0xee   : > { %s756_s10 = smov %s758_s14  ;;  %16 = sbr.rel (!%p14_p5) target bundleno = 6 (0x6), region = 73 }
  0xf5   :  { %245 = vsyncpa [#allocation3], 1 }
  0xf6   :  { %247 = vsyncpa [#allocation3 + $0x1], 1 }
  0xf7   :  { %248 = vsyncpa [#allocation4], 1 }
  0xf8   :  { %250 = vsyncpa [#allocation4 + $0x1], 1 }

</bundles_post_ra>
